<compile_context>
chip_gen: v7x
topology: tpu7x:2x2x1
jax: 0.10.0
libtpu: 0.0.40
codegen_flags: <defaults>
</compile_context>

<pallas_src>
import functools

import jax
import jax.numpy as jnp
from jax import lax
from jax.experimental import pallas as pl
from jax.experimental.pallas import tpu as pltpu


def _conv3x3_lane_dense(x, w_taps, b, *, H, W, keep_left, keep_right, apply_relu):
    """3x3 'same' convolution in lane-dense layout.

    x:         (Cin, H*W)    f32 value, row-major flattened spatial axis.
    w_taps:    (9, Cout, Cin) tap-major weights, tap index t = 3*kh + kw.
    b:         (Cout, 1)     bias (broadcasts along lanes).
    keep_*:    (1, H*W)      boolean column masks (shared by both convs).
    returns:   (Cout, H*W)   f32.
    """
    cin = x.shape[0]
    cout = w_taps.shape[1]
    hw = H * W

    # Zero-pad the flat spatial axis by W+1 on each side.  A tap offset
    # delta = dh*W + dw then becomes a contiguous static lane slice of this
    # buffer: out-of-image rows land entirely in the zero padding, and the
    # only remaining contamination (w wrapping into the neighbouring row) is
    # removed by the column masks below.
    zpad = jnp.zeros((cin, W + 1), jnp.float32)
    xp = jnp.concatenate([zpad, x, zpad], axis=1)          # (Cin, H*W + 2W + 2)

    acc = jnp.zeros((cout, hw), jnp.float32)
    t = 0
    for kh in range(3):
        for kw in range(3):
            dh, dw = kh - 1, kw - 1
            start = (W + 1) + dh * W + dw                  # static, in [0, 2W+2]
            sh = xp[:, start:start + hw]                   # (Cin, H*W)
            if dw == -1:
                sh = jnp.where(keep_left, sh, 0.0)
            elif dw == 1:
                sh = jnp.where(keep_right, sh, 0.0)
            acc = acc + jnp.dot(w_taps[t], sh,
                                preferred_element_type=jnp.float32)
            t += 1

    acc = acc + b
    if apply_relu:
        acc = jnp.maximum(acc, 0.0)
    return acc


def _rnet_kernel(x_ref, w1_ref, b1_ref, w2_ref, b2_ref, o_ref, *, H, W):
    """Fused conv1 -> ReLU -> conv2 for one batch element.

    x_ref:  (1, Cin, H*W)     w1_ref: (9, Cmid, Cin)    b1_ref: (Cmid, 1)
    w2_ref: (9, Cout, Cmid)   b2_ref: (Cout, 1)         o_ref:  (1, Cout, H*W)
    """
    hw = H * W
    # Column index of every flat lane (output coordinates); shared masks.
    ww = lax.broadcasted_iota(jnp.int32, (1, hw), 1) % W
    keep_left = ww >= 1            # valid outputs for taps reading column w-1
    keep_right = ww <= W - 2       # valid outputs for taps reading column w+1

    x = x_ref[0]                                           # (Cin, H*W)
    h = _conv3x3_lane_dense(x, w1_ref[...], b1_ref[...], H=H, W=W,
                            keep_left=keep_left, keep_right=keep_right,
                            apply_relu=True)               # (Cmid, H*W), in vregs
    y = _conv3x3_lane_dense(h, w2_ref[...], b2_ref[...], H=H, W=W,
                            keep_left=keep_left, keep_right=keep_right,
                            apply_relu=False)              # (Cout, H*W)
    o_ref[0] = y.astype(o_ref.dtype)


def rnet_forward(x_nchw, params):
    """RNet forward: Sequential(Conv2d(4->8,3,p=1), ReLU, Conv2d(8->4,3,p=1)).

    Input/output follow the PyTorch NCHW convention.  Internally the spatial
    dims are flattened (free reshape) so channels sit on sublanes and H*W on
    lanes (lane-dense), and both convs + ReLU run in one Pallas kernel.
    """
    (w1, b1), (w2, b2) = params
    N, Cin, H, W = x_nchw.shape
    Cmid = w1.shape[-1]
    Cout = w2.shape[-1]
    HW = H * W

    x_flat = x_nchw.reshape(N, Cin, HW)                    # free reshape (NCHW is contiguous)
    # Tap-major weights (9, Cout, Cin) and column bias (Cout, 1): tiny one-time
    # wrapper reshapes (~1 KiB), resident in VMEM for the whole grid.
    w1_t = jnp.transpose(w1.reshape(9, Cin, Cmid), (0, 2, 1))   # (9, Cmid, Cin)
    w2_t = jnp.transpose(w2.reshape(9, Cmid, Cout), (0, 2, 1))  # (9, Cout, Cmid)
    b1_c = b1.reshape(Cmid, 1)
    b2_c = b2.reshape(Cout, 1)

    kernel = functools.partial(_rnet_kernel, H=H, W=W)
    y_flat = pl.pallas_call(
        kernel,
        out_shape=jax.ShapeDtypeStruct((N, Cout, HW), x_nchw.dtype),
        grid_spec=pl.GridSpec(
            grid=(N,),
            in_specs=[
                pl.BlockSpec((1, Cin, HW), lambda n: (n, 0, 0)),
                pl.BlockSpec((9, Cmid, Cin), lambda n: (0, 0, 0)),
                pl.BlockSpec((Cmid, 1), lambda n: (0, 0)),
                pl.BlockSpec((9, Cout, Cmid), lambda n: (0, 0, 0)),
                pl.BlockSpec((Cout, 1), lambda n: (0, 0)),
            ],
            out_specs=pl.BlockSpec((1, Cout, HW), lambda n: (n, 0, 0)),
        ),
        compiler_params=pltpu.CompilerParams(
            dimension_semantics=("parallel",),   # batch across TCs on v7x
        ),
    )(x_flat, w1_t, b1_c, w2_t, b2_c)
    return y_flat.reshape(N, Cout, H, W)                   # free reshape back to NCHW


def init_params(key, cin=4, cmid=8, cout=4):
    """Deterministic synthetic parameter init (HWIO weight layout)."""
    k1, k2, k3, k4 = jax.random.split(key, 4)
    w1 = jax.random.normal(k1, (3, 3, cin, cmid), jnp.float32) * 0.1
    b1 = jax.random.normal(k2, (cmid,), jnp.float32) * 0.1
    w2 = jax.random.normal(k3, (3, 3, cmid, cout), jnp.float32) * 0.1
    b2 = jax.random.normal(k4, (cout,), jnp.float32) * 0.1
    return ((w1, b1), (w2, b2))


def _reference_forward(x_nchw, params):
    """Pure-JAX reference (lax conv) for correctness checking."""
    (w1, b1), (w2, b2) = params
    dn = lax.conv_dimension_numbers(x_nchw.shape, w1.shape, ("NCHW", "HWIO", "NCHW"))
    h = lax.conv_general_dilated(x_nchw, w1, (1, 1), "SAME", dimension_numbers=dn)
    h = jnp.maximum(h + b1[None, :, None, None], 0.0)
    dn2 = lax.conv_dimension_numbers(h.shape, w2.shape, ("NCHW", "HWIO", "NCHW"))
    y = lax.conv_general_dilated(h, w2, (1, 1), "SAME", dimension_numbers=dn2)
    return y + b2[None, :, None, None]


if __name__ == "__main__":
    key = jax.random.PRNGKey(0)
    kx, kp = jax.random.split(key)
    x = jax.random.normal(kx, (2, 4, 16, 16), jnp.float32)   # NCHW, like torch
    params = init_params(kp)

    out = jax.block_until_ready(rnet_forward(x, params))
    ref = jax.block_until_ready(_reference_forward(x, params))
    assert out.shape == (2, 4, 16, 16)
    assert jnp.max(jnp.abs(out - ref)) < 1e-4
    print("KERNEL_OK")
</pallas_src>

<mosaic_0001>
module attributes {stable_mosaic.version = 11 : i64} {
  func.func @_rnet_kernel(%arg0: i32, %arg1: memref<1x4x256xf32, #tpu.memory_space<vmem>>, %arg2: memref<9x8x4xf32, #tpu.memory_space<vmem>>, %arg3: memref<8x1xf32, #tpu.memory_space<vmem>>, %arg4: memref<9x4x8xf32, #tpu.memory_space<vmem>>, %arg5: memref<4x1xf32, #tpu.memory_space<vmem>>, %arg6: memref<1x4x256xf32, #tpu.memory_space<vmem>>) attributes {dimension_semantics = [#tpu.dimension_semantics<parallel>], iteration_bounds = array<i64: 2>, scalar_prefetch = 0 : i64, scratch_operands = 0 : i64, tpu.core_type = #tpu.core_type<tc>, window_params = [{transform_indices = @transform_0, window_bounds = array<i64: 1, 4, 256>}, {pipeline_mode = #tpu.pipeline_mode<synchronous>, transform_indices = @transform_1, window_bounds = array<i64: 9, 8, 4>}, {pipeline_mode = #tpu.pipeline_mode<synchronous>, transform_indices = @transform_2, window_bounds = array<i64: 8, 1>}, {pipeline_mode = #tpu.pipeline_mode<synchronous>, transform_indices = @transform_3, window_bounds = array<i64: 9, 4, 8>}, {pipeline_mode = #tpu.pipeline_mode<synchronous>, transform_indices = @transform_4, window_bounds = array<i64: 4, 1>}, {transform_indices = @transform_5, window_bounds = array<i64: 1, 4, 256>}]} {
    %0 = tpu.iota {dimensions = array<i32: 1>} : vector<1x256xi32>
    %c16_i32 = arith.constant 16 : i32
    %c0_i32 = arith.constant 0 : i32
    %1 = arith.cmpi eq, %c16_i32, %c0_i32 : i32
    %c1_i32 = arith.constant 1 : i32
    %2 = arith.select %1, %c1_i32, %c16_i32 : i32
    %3 = vector.broadcast %2 : i32 to vector<1x256xi32>
    %4 = arith.remsi %0, %3 : vector<1x256xi32>
    %c0_i32_0 = arith.constant 0 : i32
    %5 = vector.broadcast %c0_i32_0 : i32 to vector<1x256xi32>
    %6 = arith.cmpi ne, %4, %5 : vector<1x256xi32>
    %c0_i32_1 = arith.constant 0 : i32
    %7 = vector.broadcast %c0_i32_1 : i32 to vector<1x256xi32>
    %8 = arith.cmpi slt, %4, %7 : vector<1x256xi32>
    %c0_i32_2 = arith.constant 0 : i32
    %9 = arith.cmpi slt, %2, %c0_i32_2 : i32
    %10 = vector.broadcast %9 : i1 to vector<1x256xi1>
    %11 = vector.broadcast %10 : vector<1x256xi1> to vector<1x256xi1>
    %12 = arith.xori %8, %11 : vector<1x256xi1>
    %13 = arith.andi %12, %6 : vector<1x256xi1>
    %14 = vector.broadcast %2 : i32 to vector<1x256xi32>
    %15 = arith.addi %4, %14 : vector<1x256xi32>
    %16 = arith.select %13, %15, %4 : vector<1x256xi1>, vector<1x256xi32>
    %c1_i32_3 = arith.constant 1 : i32
    %17 = vector.broadcast %c1_i32_3 : i32 to vector<1x256xi32>
    %18 = arith.cmpi sge, %16, %17 : vector<1x256xi32>
    %c14_i32 = arith.constant 14 : i32
    %19 = vector.broadcast %c14_i32 : i32 to vector<1x256xi32>
    %20 = arith.cmpi sle, %16, %19 : vector<1x256xi32>
    %c0 = arith.constant 0 : index
    %c0_4 = arith.constant 0 : index
    %c0_5 = arith.constant 0 : index
    %21 = vector.load %arg1[%c0, %c0_4, %c0_5] : memref<1x4x256xf32, #tpu.memory_space<vmem>>, vector<1x4x256xf32>
    %22 = vector.shape_cast %21 : vector<1x4x256xf32> to vector<4x256xf32>
    %c0_6 = arith.constant 0 : index
    %c0_7 = arith.constant 0 : index
    %c0_8 = arith.constant 0 : index
    %23 = vector.load %arg2[%c0_6, %c0_7, %c0_8] : memref<9x8x4xf32, #tpu.memory_space<vmem>>, vector<9x8x4xf32>
    %c0_9 = arith.constant 0 : index
    %c0_10 = arith.constant 0 : index
    %24 = vector.load %arg3[%c0_9, %c0_10] : memref<8x1xf32, #tpu.memory_space<vmem>>, vector<8x1xf32>
    %cst = arith.constant 0.000000e+00 : f32
    %25 = vector.broadcast %cst : f32 to vector<4x17xf32>
    %26 = tpu.concatenate %25, %22, %25 in 1 : vector<4x17xf32>, vector<4x256xf32>, vector<4x17xf32> -> vector<4x290xf32>
    %cst_11 = arith.constant 0.000000e+00 : f32
    %27 = vector.broadcast %cst_11 : f32 to vector<8x256xf32>
    %28 = vector.extract_strided_slice %26 {offsets = [0, 0], sizes = [4, 256], strides = [1, 1]} : vector<4x290xf32> to vector<4x256xf32>
    %cst_12 = arith.constant 0.000000e+00 : f32
    %29 = vector.shape_cast %18 : vector<1x256xi1> to vector<1x256xi1>
    %30 = vector.broadcast %29 : vector<1x256xi1> to vector<4x256xi1>
    %31 = vector.broadcast %cst_12 : f32 to vector<4x256xf32>
    %32 = arith.select %30, %28, %31 : vector<4x256xi1>, vector<4x256xf32>
    %33 = vector.extract_strided_slice %23 {offsets = [0, 0, 0], sizes = [1, 8, 4], strides = [1, 1, 1]} : vector<9x8x4xf32> to vector<1x8x4xf32>
    %34 = vector.shape_cast %33 : vector<1x8x4xf32> to vector<8x4xf32>
    %cst_13 = arith.constant dense<0.000000e+00> : vector<8x256xf32>
    %35 = tpu.matmul %34, %32, %cst_13 {dimension_numbers = #tpu.dot_dimension_numbers<[1], [0], [0], [1], [0, 0, 1, 1], [], []>} : vector<8x4xf32>, vector<4x256xf32>, vector<8x256xf32> -> vector<8x256xf32>
    %36 = arith.addf %27, %35 : vector<8x256xf32>
    %37 = vector.extract_strided_slice %26 {offsets = [0, 1], sizes = [4, 256], strides = [1, 1]} : vector<4x290xf32> to vector<4x256xf32>
    %38 = vector.extract_strided_slice %23 {offsets = [1, 0, 0], sizes = [1, 8, 4], strides = [1, 1, 1]} : vector<9x8x4xf32> to vector<1x8x4xf32>
    %39 = vector.shape_cast %38 : vector<1x8x4xf32> to vector<8x4xf32>
    %cst_14 = arith.constant dense<0.000000e+00> : vector<8x256xf32>
    %40 = tpu.matmul %39, %37, %cst_14 {dimension_numbers = #tpu.dot_dimension_numbers<[1], [0], [0], [1], [0, 0, 1, 1], [], []>} : vector<8x4xf32>, vector<4x256xf32>, vector<8x256xf32> -> vector<8x256xf32>
    %41 = arith.addf %36, %40 : vector<8x256xf32>
    %42 = vector.extract_strided_slice %26 {offsets = [0, 2], sizes = [4, 256], strides = [1, 1]} : vector<4x290xf32> to vector<4x256xf32>
    %cst_15 = arith.constant 0.000000e+00 : f32
    %43 = vector.shape_cast %20 : vector<1x256xi1> to vector<1x256xi1>
    %44 = vector.broadcast %43 : vector<1x256xi1> to vector<4x256xi1>
    %45 = vector.broadcast %cst_15 : f32 to vector<4x256xf32>
    %46 = arith.select %44, %42, %45 : vector<4x256xi1>, vector<4x256xf32>
    %47 = vector.extract_strided_slice %23 {offsets = [2, 0, 0], sizes = [1, 8, 4], strides = [1, 1, 1]} : vector<9x8x4xf32> to vector<1x8x4xf32>
    %48 = vector.shape_cast %47 : vector<1x8x4xf32> to vector<8x4xf32>
    %cst_16 = arith.constant dense<0.000000e+00> : vector<8x256xf32>
    %49 = tpu.matmul %48, %46, %cst_16 {dimension_numbers = #tpu.dot_dimension_numbers<[1], [0], [0], [1], [0, 0, 1, 1], [], []>} : vector<8x4xf32>, vector<4x256xf32>, vector<8x256xf32> -> vector<8x256xf32>
    %50 = arith.addf %41, %49 : vector<8x256xf32>
    %51 = vector.extract_strided_slice %26 {offsets = [0, 16], sizes = [4, 256], strides = [1, 1]} : vector<4x290xf32> to vector<4x256xf32>
    %cst_17 = arith.constant 0.000000e+00 : f32
    %52 = vector.shape_cast %18 : vector<1x256xi1> to vector<1x256xi1>
    %53 = vector.broadcast %52 : vector<1x256xi1> to vector<4x256xi1>
    %54 = vector.broadcast %cst_17 : f32 to vector<4x256xf32>
    %55 = arith.select %53, %51, %54 : vector<4x256xi1>, vector<4x256xf32>
    %56 = vector.extract_strided_slice %23 {offsets = [3, 0, 0], sizes = [1, 8, 4], strides = [1, 1, 1]} : vector<9x8x4xf32> to vector<1x8x4xf32>
    %57 = vector.shape_cast %56 : vector<1x8x4xf32> to vector<8x4xf32>
    %cst_18 = arith.constant dense<0.000000e+00> : vector<8x256xf32>
    %58 = tpu.matmul %57, %55, %cst_18 {dimension_numbers = #tpu.dot_dimension_numbers<[1], [0], [0], [1], [0, 0, 1, 1], [], []>} : vector<8x4xf32>, vector<4x256xf32>, vector<8x256xf32> -> vector<8x256xf32>
    %59 = arith.addf %50, %58 : vector<8x256xf32>
    %60 = vector.extract_strided_slice %26 {offsets = [0, 17], sizes = [4, 256], strides = [1, 1]} : vector<4x290xf32> to vector<4x256xf32>
    %61 = vector.extract_strided_slice %23 {offsets = [4, 0, 0], sizes = [1, 8, 4], strides = [1, 1, 1]} : vector<9x8x4xf32> to vector<1x8x4xf32>
    %62 = vector.shape_cast %61 : vector<1x8x4xf32> to vector<8x4xf32>
    %cst_19 = arith.constant dense<0.000000e+00> : vector<8x256xf32>
    %63 = tpu.matmul %62, %60, %cst_19 {dimension_numbers = #tpu.dot_dimension_numbers<[1], [0], [0], [1], [0, 0, 1, 1], [], []>} : vector<8x4xf32>, vector<4x256xf32>, vector<8x256xf32> -> vector<8x256xf32>
    %64 = arith.addf %59, %63 : vector<8x256xf32>
    %65 = vector.extract_strided_slice %26 {offsets = [0, 18], sizes = [4, 256], strides = [1, 1]} : vector<4x290xf32> to vector<4x256xf32>
    %cst_20 = arith.constant 0.000000e+00 : f32
    %66 = vector.shape_cast %20 : vector<1x256xi1> to vector<1x256xi1>
    %67 = vector.broadcast %66 : vector<1x256xi1> to vector<4x256xi1>
    %68 = vector.broadcast %cst_20 : f32 to vector<4x256xf32>
    %69 = arith.select %67, %65, %68 : vector<4x256xi1>, vector<4x256xf32>
    %70 = vector.extract_strided_slice %23 {offsets = [5, 0, 0], sizes = [1, 8, 4], strides = [1, 1, 1]} : vector<9x8x4xf32> to vector<1x8x4xf32>
    %71 = vector.shape_cast %70 : vector<1x8x4xf32> to vector<8x4xf32>
    %cst_21 = arith.constant dense<0.000000e+00> : vector<8x256xf32>
    %72 = tpu.matmul %71, %69, %cst_21 {dimension_numbers = #tpu.dot_dimension_numbers<[1], [0], [0], [1], [0, 0, 1, 1], [], []>} : vector<8x4xf32>, vector<4x256xf32>, vector<8x256xf32> -> vector<8x256xf32>
    %73 = arith.addf %64, %72 : vector<8x256xf32>
    %74 = vector.extract_strided_slice %26 {offsets = [0, 32], sizes = [4, 256], strides = [1, 1]} : vector<4x290xf32> to vector<4x256xf32>
    %cst_22 = arith.constant 0.000000e+00 : f32
    %75 = vector.shape_cast %18 : vector<1x256xi1> to vector<1x256xi1>
    %76 = vector.broadcast %75 : vector<1x256xi1> to vector<4x256xi1>
    %77 = vector.broadcast %cst_22 : f32 to vector<4x256xf32>
    %78 = arith.select %76, %74, %77 : vector<4x256xi1>, vector<4x256xf32>
    %79 = vector.extract_strided_slice %23 {offsets = [6, 0, 0], sizes = [1, 8, 4], strides = [1, 1, 1]} : vector<9x8x4xf32> to vector<1x8x4xf32>
    %80 = vector.shape_cast %79 : vector<1x8x4xf32> to vector<8x4xf32>
    %cst_23 = arith.constant dense<0.000000e+00> : vector<8x256xf32>
    %81 = tpu.matmul %80, %78, %cst_23 {dimension_numbers = #tpu.dot_dimension_numbers<[1], [0], [0], [1], [0, 0, 1, 1], [], []>} : vector<8x4xf32>, vector<4x256xf32>, vector<8x256xf32> -> vector<8x256xf32>
    %82 = arith.addf %73, %81 : vector<8x256xf32>
    %83 = vector.extract_strided_slice %26 {offsets = [0, 33], sizes = [4, 256], strides = [1, 1]} : vector<4x290xf32> to vector<4x256xf32>
    %84 = vector.extract_strided_slice %23 {offsets = [7, 0, 0], sizes = [1, 8, 4], strides = [1, 1, 1]} : vector<9x8x4xf32> to vector<1x8x4xf32>
    %85 = vector.shape_cast %84 : vector<1x8x4xf32> to vector<8x4xf32>
    %cst_24 = arith.constant dense<0.000000e+00> : vector<8x256xf32>
    %86 = tpu.matmul %85, %83, %cst_24 {dimension_numbers = #tpu.dot_dimension_numbers<[1], [0], [0], [1], [0, 0, 1, 1], [], []>} : vector<8x4xf32>, vector<4x256xf32>, vector<8x256xf32> -> vector<8x256xf32>
    %87 = arith.addf %82, %86 : vector<8x256xf32>
    %88 = vector.extract_strided_slice %26 {offsets = [0, 34], sizes = [4, 256], strides = [1, 1]} : vector<4x290xf32> to vector<4x256xf32>
    %cst_25 = arith.constant 0.000000e+00 : f32
    %89 = vector.shape_cast %20 : vector<1x256xi1> to vector<1x256xi1>
    %90 = vector.broadcast %89 : vector<1x256xi1> to vector<4x256xi1>
    %91 = vector.broadcast %cst_25 : f32 to vector<4x256xf32>
    %92 = arith.select %90, %88, %91 : vector<4x256xi1>, vector<4x256xf32>
    %93 = vector.extract_strided_slice %23 {offsets = [8, 0, 0], sizes = [1, 8, 4], strides = [1, 1, 1]} : vector<9x8x4xf32> to vector<1x8x4xf32>
    %94 = vector.shape_cast %93 : vector<1x8x4xf32> to vector<8x4xf32>
    %cst_26 = arith.constant dense<0.000000e+00> : vector<8x256xf32>
    %95 = tpu.matmul %94, %92, %cst_26 {dimension_numbers = #tpu.dot_dimension_numbers<[1], [0], [0], [1], [0, 0, 1, 1], [], []>} : vector<8x4xf32>, vector<4x256xf32>, vector<8x256xf32> -> vector<8x256xf32>
    %96 = arith.addf %87, %95 : vector<8x256xf32>
    %97 = vector.broadcast %24 : vector<8x1xf32> to vector<8x256xf32>
    %98 = arith.addf %96, %97 : vector<8x256xf32>
    %cst_27 = arith.constant 0.000000e+00 : f32
    %99 = vector.broadcast %cst_27 : f32 to vector<8x256xf32>
    %100 = arith.maximumf %98, %99 : vector<8x256xf32>
    %c0_28 = arith.constant 0 : index
    %c0_29 = arith.constant 0 : index
    %c0_30 = arith.constant 0 : index
    %101 = vector.load %arg4[%c0_28, %c0_29, %c0_30] : memref<9x4x8xf32, #tpu.memory_space<vmem>>, vector<9x4x8xf32>
    %c0_31 = arith.constant 0 : index
    %c0_32 = arith.constant 0 : index
    %102 = vector.load %arg5[%c0_31, %c0_32] : memref<4x1xf32, #tpu.memory_space<vmem>>, vector<4x1xf32>
    %cst_33 = arith.constant 0.000000e+00 : f32
    %103 = vector.broadcast %cst_33 : f32 to vector<8x17xf32>
    %104 = tpu.concatenate %103, %100, %103 in 1 : vector<8x17xf32>, vector<8x256xf32>, vector<8x17xf32> -> vector<8x290xf32>
    %cst_34 = arith.constant 0.000000e+00 : f32
    %105 = vector.broadcast %cst_34 : f32 to vector<4x256xf32>
    %106 = vector.extract_strided_slice %104 {offsets = [0, 0], sizes = [8, 256], strides = [1, 1]} : vector<8x290xf32> to vector<8x256xf32>
    %cst_35 = arith.constant 0.000000e+00 : f32
    %107 = vector.shape_cast %18 : vector<1x256xi1> to vector<1x256xi1>
    %108 = vector.broadcast %107 : vector<1x256xi1> to vector<8x256xi1>
    %109 = vector.broadcast %cst_35 : f32 to vector<8x256xf32>
    %110 = arith.select %108, %106, %109 : vector<8x256xi1>, vector<8x256xf32>
    %111 = vector.extract_strided_slice %101 {offsets = [0, 0, 0], sizes = [1, 4, 8], strides = [1, 1, 1]} : vector<9x4x8xf32> to vector<1x4x8xf32>
    %112 = vector.shape_cast %111 : vector<1x4x8xf32> to vector<4x8xf32>
    %cst_36 = arith.constant dense<0.000000e+00> : vector<4x256xf32>
    %113 = tpu.matmul %112, %110, %cst_36 {dimension_numbers = #tpu.dot_dimension_numbers<[1], [0], [0], [1], [0, 0, 1, 1], [], []>} : vector<4x8xf32>, vector<8x256xf32>, vector<4x256xf32> -> vector<4x256xf32>
    %114 = arith.addf %105, %113 : vector<4x256xf32>
    %115 = vector.extract_strided_slice %104 {offsets = [0, 1], sizes = [8, 256], strides = [1, 1]} : vector<8x290xf32> to vector<8x256xf32>
    %116 = vector.extract_strided_slice %101 {offsets = [1, 0, 0], sizes = [1, 4, 8], strides = [1, 1, 1]} : vector<9x4x8xf32> to vector<1x4x8xf32>
    %117 = vector.shape_cast %116 : vector<1x4x8xf32> to vector<4x8xf32>
    %cst_37 = arith.constant dense<0.000000e+00> : vector<4x256xf32>
    %118 = tpu.matmul %117, %115, %cst_37 {dimension_numbers = #tpu.dot_dimension_numbers<[1], [0], [0], [1], [0, 0, 1, 1], [], []>} : vector<4x8xf32>, vector<8x256xf32>, vector<4x256xf32> -> vector<4x256xf32>
    %119 = arith.addf %114, %118 : vector<4x256xf32>
    %120 = vector.extract_strided_slice %104 {offsets = [0, 2], sizes = [8, 256], strides = [1, 1]} : vector<8x290xf32> to vector<8x256xf32>
    %cst_38 = arith.constant 0.000000e+00 : f32
    %121 = vector.shape_cast %20 : vector<1x256xi1> to vector<1x256xi1>
    %122 = vector.broadcast %121 : vector<1x256xi1> to vector<8x256xi1>
    %123 = vector.broadcast %cst_38 : f32 to vector<8x256xf32>
    %124 = arith.select %122, %120, %123 : vector<8x256xi1>, vector<8x256xf32>
    %125 = vector.extract_strided_slice %101 {offsets = [2, 0, 0], sizes = [1, 4, 8], strides = [1, 1, 1]} : vector<9x4x8xf32> to vector<1x4x8xf32>
    %126 = vector.shape_cast %125 : vector<1x4x8xf32> to vector<4x8xf32>
    %cst_39 = arith.constant dense<0.000000e+00> : vector<4x256xf32>
    %127 = tpu.matmul %126, %124, %cst_39 {dimension_numbers = #tpu.dot_dimension_numbers<[1], [0], [0], [1], [0, 0, 1, 1], [], []>} : vector<4x8xf32>, vector<8x256xf32>, vector<4x256xf32> -> vector<4x256xf32>
    %128 = arith.addf %119, %127 : vector<4x256xf32>
    %129 = vector.extract_strided_slice %104 {offsets = [0, 16], sizes = [8, 256], strides = [1, 1]} : vector<8x290xf32> to vector<8x256xf32>
    %cst_40 = arith.constant 0.000000e+00 : f32
    %130 = vector.shape_cast %18 : vector<1x256xi1> to vector<1x256xi1>
    %131 = vector.broadcast %130 : vector<1x256xi1> to vector<8x256xi1>
    %132 = vector.broadcast %cst_40 : f32 to vector<8x256xf32>
    %133 = arith.select %131, %129, %132 : vector<8x256xi1>, vector<8x256xf32>
    %134 = vector.extract_strided_slice %101 {offsets = [3, 0, 0], sizes = [1, 4, 8], strides = [1, 1, 1]} : vector<9x4x8xf32> to vector<1x4x8xf32>
    %135 = vector.shape_cast %134 : vector<1x4x8xf32> to vector<4x8xf32>
    %cst_41 = arith.constant dense<0.000000e+00> : vector<4x256xf32>
    %136 = tpu.matmul %135, %133, %cst_41 {dimension_numbers = #tpu.dot_dimension_numbers<[1], [0], [0], [1], [0, 0, 1, 1], [], []>} : vector<4x8xf32>, vector<8x256xf32>, vector<4x256xf32> -> vector<4x256xf32>
    %137 = arith.addf %128, %136 : vector<4x256xf32>
    %138 = vector.extract_strided_slice %104 {offsets = [0, 17], sizes = [8, 256], strides = [1, 1]} : vector<8x290xf32> to vector<8x256xf32>
    %139 = vector.extract_strided_slice %101 {offsets = [4, 0, 0], sizes = [1, 4, 8], strides = [1, 1, 1]} : vector<9x4x8xf32> to vector<1x4x8xf32>
    %140 = vector.shape_cast %139 : vector<1x4x8xf32> to vector<4x8xf32>
    %cst_42 = arith.constant dense<0.000000e+00> : vector<4x256xf32>
    %141 = tpu.matmul %140, %138, %cst_42 {dimension_numbers = #tpu.dot_dimension_numbers<[1], [0], [0], [1], [0, 0, 1, 1], [], []>} : vector<4x8xf32>, vector<8x256xf32>, vector<4x256xf32> -> vector<4x256xf32>
    %142 = arith.addf %137, %141 : vector<4x256xf32>
    %143 = vector.extract_strided_slice %104 {offsets = [0, 18], sizes = [8, 256], strides = [1, 1]} : vector<8x290xf32> to vector<8x256xf32>
    %cst_43 = arith.constant 0.000000e+00 : f32
    %144 = vector.shape_cast %20 : vector<1x256xi1> to vector<1x256xi1>
    %145 = vector.broadcast %144 : vector<1x256xi1> to vector<8x256xi1>
    %146 = vector.broadcast %cst_43 : f32 to vector<8x256xf32>
    %147 = arith.select %145, %143, %146 : vector<8x256xi1>, vector<8x256xf32>
    %148 = vector.extract_strided_slice %101 {offsets = [5, 0, 0], sizes = [1, 4, 8], strides = [1, 1, 1]} : vector<9x4x8xf32> to vector<1x4x8xf32>
    %149 = vector.shape_cast %148 : vector<1x4x8xf32> to vector<4x8xf32>
    %cst_44 = arith.constant dense<0.000000e+00> : vector<4x256xf32>
    %150 = tpu.matmul %149, %147, %cst_44 {dimension_numbers = #tpu.dot_dimension_numbers<[1], [0], [0], [1], [0, 0, 1, 1], [], []>} : vector<4x8xf32>, vector<8x256xf32>, vector<4x256xf32> -> vector<4x256xf32>
    %151 = arith.addf %142, %150 : vector<4x256xf32>
    %152 = vector.extract_strided_slice %104 {offsets = [0, 32], sizes = [8, 256], strides = [1, 1]} : vector<8x290xf32> to vector<8x256xf32>
    %cst_45 = arith.constant 0.000000e+00 : f32
    %153 = vector.shape_cast %18 : vector<1x256xi1> to vector<1x256xi1>
    %154 = vector.broadcast %153 : vector<1x256xi1> to vector<8x256xi1>
    %155 = vector.broadcast %cst_45 : f32 to vector<8x256xf32>
    %156 = arith.select %154, %152, %155 : vector<8x256xi1>, vector<8x256xf32>
    %157 = vector.extract_strided_slice %101 {offsets = [6, 0, 0], sizes = [1, 4, 8], strides = [1, 1, 1]} : vector<9x4x8xf32> to vector<1x4x8xf32>
    %158 = vector.shape_cast %157 : vector<1x4x8xf32> to vector<4x8xf32>
    %cst_46 = arith.constant dense<0.000000e+00> : vector<4x256xf32>
    %159 = tpu.matmul %158, %156, %cst_46 {dimension_numbers = #tpu.dot_dimension_numbers<[1], [0], [0], [1], [0, 0, 1, 1], [], []>} : vector<4x8xf32>, vector<8x256xf32>, vector<4x256xf32> -> vector<4x256xf32>
    %160 = arith.addf %151, %159 : vector<4x256xf32>
    %161 = vector.extract_strided_slice %104 {offsets = [0, 33], sizes = [8, 256], strides = [1, 1]} : vector<8x290xf32> to vector<8x256xf32>
    %162 = vector.extract_strided_slice %101 {offsets = [7, 0, 0], sizes = [1, 4, 8], strides = [1, 1, 1]} : vector<9x4x8xf32> to vector<1x4x8xf32>
    %163 = vector.shape_cast %162 : vector<1x4x8xf32> to vector<4x8xf32>
    %cst_47 = arith.constant dense<0.000000e+00> : vector<4x256xf32>
    %164 = tpu.matmul %163, %161, %cst_47 {dimension_numbers = #tpu.dot_dimension_numbers<[1], [0], [0], [1], [0, 0, 1, 1], [], []>} : vector<4x8xf32>, vector<8x256xf32>, vector<4x256xf32> -> vector<4x256xf32>
    %165 = arith.addf %160, %164 : vector<4x256xf32>
    %166 = vector.extract_strided_slice %104 {offsets = [0, 34], sizes = [8, 256], strides = [1, 1]} : vector<8x290xf32> to vector<8x256xf32>
    %cst_48 = arith.constant 0.000000e+00 : f32
    %167 = vector.shape_cast %20 : vector<1x256xi1> to vector<1x256xi1>
    %168 = vector.broadcast %167 : vector<1x256xi1> to vector<8x256xi1>
    %169 = vector.broadcast %cst_48 : f32 to vector<8x256xf32>
    %170 = arith.select %168, %166, %169 : vector<8x256xi1>, vector<8x256xf32>
    %171 = vector.extract_strided_slice %101 {offsets = [8, 0, 0], sizes = [1, 4, 8], strides = [1, 1, 1]} : vector<9x4x8xf32> to vector<1x4x8xf32>
    %172 = vector.shape_cast %171 : vector<1x4x8xf32> to vector<4x8xf32>
    %cst_49 = arith.constant dense<0.000000e+00> : vector<4x256xf32>
    %173 = tpu.matmul %172, %170, %cst_49 {dimension_numbers = #tpu.dot_dimension_numbers<[1], [0], [0], [1], [0, 0, 1, 1], [], []>} : vector<4x8xf32>, vector<8x256xf32>, vector<4x256xf32> -> vector<4x256xf32>
    %174 = arith.addf %165, %173 : vector<4x256xf32>
    %175 = vector.broadcast %102 : vector<4x1xf32> to vector<4x256xf32>
    %176 = arith.addf %174, %175 : vector<4x256xf32>
    %c0_50 = arith.constant 0 : index
    %c0_51 = arith.constant 0 : index
    %c0_52 = arith.constant 0 : index
    %177 = vector.load %arg6[%c0_50, %c0_51, %c0_52] : memref<1x4x256xf32, #tpu.memory_space<vmem>>, vector<1x4x256xf32>
    %178 = vector.shape_cast %177 : vector<1x4x256xf32> to vector<4x256xf32>
    %179 = vector.shape_cast %176 : vector<4x256xf32> to vector<1x4x256xf32>
    tpu.vector_store %arg6[%c0_50, %c0_51, %c0_52], %179 {strides = array<i32>} : memref<1x4x256xf32, #tpu.memory_space<vmem>>, vector<1x4x256xf32>,
    return
  }
  func.func @transform_0(%arg0: i32) -> (i32, i32, i32) {
    %c0_i32 = arith.constant 0 : i32
    %c0_i32_0 = arith.constant 0 : i32
    %c0_i32_1 = arith.constant 0 : i32
    return %arg0, %c0_i32, %c0_i32_0 : i32, i32, i32
  }
  func.func @transform_1(%arg0: i32) -> (i32, i32, i32) {
    %c0_i32 = arith.constant 0 : i32
    %c0_i32_0 = arith.constant 0 : i32
    %c0_i32_1 = arith.constant 0 : i32
    %c0_i32_2 = arith.constant 0 : i32
    return %c0_i32, %c0_i32_0, %c0_i32_1 : i32, i32, i32
  }
  func.func @transform_2(%arg0: i32) -> (i32, i32) {
    %c0_i32 = arith.constant 0 : i32
    %c0_i32_0 = arith.constant 0 : i32
    %c0_i32_1 = arith.constant 0 : i32
    return %c0_i32, %c0_i32_0 : i32, i32
  }
  func.func @transform_3(%arg0: i32) -> (i32, i32, i32) {
    %c0_i32 = arith.constant 0 : i32
    %c0_i32_0 = arith.constant 0 : i32
    %c0_i32_1 = arith.constant 0 : i32
    %c0_i32_2 = arith.constant 0 : i32
    return %c0_i32, %c0_i32_0, %c0_i32_1 : i32, i32, i32
  }
  func.func @transform_4(%arg0: i32) -> (i32, i32) {
    %c0_i32 = arith.constant 0 : i32
    %c0_i32_0 = arith.constant 0 : i32
    %c0_i32_1 = arith.constant 0 : i32
    return %c0_i32, %c0_i32_0 : i32, i32
  }
  func.func @transform_5(%arg0: i32) -> (i32, i32, i32) {
    %c0_i32 = arith.constant 0 : i32
    %c0_i32_0 = arith.constant 0 : i32
    %c0_i32_1 = arith.constant 0 : i32
    return %arg0, %c0_i32, %c0_i32_0 : i32, i32, i32
  }
}

</mosaic_0001>

<bundles_post_ra>
// kernel: tpu_custom_call.1
= control target key start
LH: loop header
LB: loop body
LE: loop exit
PB: predicated region body
PF: predicated region fallthrough
CT: control target
= control target key end

     0   :  { %10 = vsyncpa [#allocation3], 0  ;;  %s2635_s0 = inlined_call_operand.vmem [shape: f32[2,4,256], index: 0, kind: input, shape index: {}]   ;;  %s2636_s1 = inlined_call_operand.vmem [shape: f32[9,8,4], index: 1, kind: input, shape index: {}]   ;;  %s2637_s2 = inlined_call_operand.vmem [shape: f32[8,1], index: 2, kind: input, shape index: {}]   ;;  %s2638_s3 = inlined_call_operand.vmem [shape: f32[9,4,8], index: 3, kind: input, shape index: {}]   ;;  %s2639_s4 = inlined_call_operand.vmem [shape: f32[4,1], index: 4, kind: input, shape index: {}]   ;;  %s2640_s5 = inlined_call_operand.hbm [shape: f32[2,4,256], index: 5, kind: output, shape index: {}]  }
   0x1   :  { %12 = vsyncpa [#allocation3 + $0x1], 0  ;;  %s2256_s18 = smov 0   ;;  %s2258_s19 = smov 0  }
   0x2   :  { %s2260_s20 = smov 0   ;;  %s2262_s21 = smov 0  }
   0x3 LB: > { %s2277_s22 = sadd.s32 4294967295, %s2212_s21   ;;  %s2004_s23 = sadd.s32 4294967294, %s2212_s21   ;;  %s2212_s21 = sphi %s2262_s21, %s2654_s21   ;;  %s2208_s20 = sphi %s2260_s20, %s2653_s20   ;;  %s2204_s19 = sphi %s2258_s19, %s2652_s19   ;;  %s2200_s18 = sphi %s2256_s18, %s2651_s18  }
   0x4   : > { %s2281_s24 = sadd.s32 1, %s2212_s21   ;;  %s135_s25 = sadd.s32 1, %s2208_s20 }
   0x5   : > { %s132_s26 = ssub.s32 %s2212_s21, %s2281_s24  ;;  %p145_p0 = scmp.ne.s32.totalorder %s2208_s20, %s2204_s19 }
   0x6   : > { %p133_p1 = scmp.eq.s32.totalorder %s132_s26, 0  ;;  %p146_p2 = scmp.eq.s32.totalorder %s2277_s22, 1 }
   0x7   : > { %p151_p3 = scmp.ne.s32.totalorder %s2204_s19, %s2200_s18  ;;  %p152_p4 = scmp.eq.s32.totalorder %s2004_s23, 1 }
   0x8   : > { %s2292_s27 = scalar_select %p133_p1, %s2208_s20, %s135_s25  }
   0x9   : > { %p2294_p5 = por %p146_p2, %p145_p0  ;;  %p2298_p6 = por %p152_p4, %p151_p3 }
   0xa   : > { %p2007_p7 = scmp.ge.s32.totalorder %s2212_s21, 1  ;;  %p190_p8 = scmp.lt.s32.totalorder %s2212_s21, 3 }
   0xc   : > { %p191_p9 = pnand %p2007_p7, %p190_p8 }
   0xd   : > { %p218_p10 = scmp.lt.s32.totalorder (!%p191_p9), %s2277_s22, 1  ;;  %s2214_s10 = smov (!%p191_p9), 17   ;;  %vm271_vm0 = vcmask (!%p191_p9), 138240   ;;  %v2215_v2 = vmov (!%p191_p9), 0.0   ;;  %v264_v8 = vld [vmem:[%s2637_s2] sm:$0xff] (!%p191_p9)  ;;  %v2224_v9 = vmov (!%p191_p9), 0   ;;  %v223_v10 = vlaneseq (!%p191_p9) }
   0xe   : > { %194 = sbr.rel (%p191_p9) target bundleno = 1084 (0x43c), region = 40  ;;  %368 = vmatprep.mubr.f32.mxu0 (!%p191_p9), %v2215_v2  ;;  %1225 = vmatprep.mubr.f32.mxu1 (!%p191_p9), %v2215_v2  ;;  %s2216_s11 = smov (!%p191_p9), 127   ;;  %vm292_vm1 = vcmask (!%p191_p9), 1039360   ;;  %vm299_vm2 = vcmask (!%p191_p9), 1043456   ;;  %v256_v22 = vld [vmem:[%s2636_s1 + $0x8] sm:$0xff] (!%p191_p9)  ;;  %vm295_vm4 = vcmask (!%p191_p9), 31744  }
   0xf   : > { %s2217_s12 = smov (!%p191_p9), 126   ;;  %s2218_s13 = smov (!%p191_p9), 112   ;;  %2148 = vset.pattern.permute.xlu0 (!%p191_p9), %v2224_v9  ;;  %v224_v11 = vand.u32 (!%p191_p9), 127, %v223_v10  ;;  %vm465_vm6 = vcmask (!%p191_p9), 1031168   ;;  %v255_v35 = vld [vmem:[%s2636_s1] sm:$0xff] (!%p191_p9)  ;;  %vm560_vm9 = vcmask (!%p191_p9), 916480  }
  0x10   : > { %s2219_s14 = smov (!%p191_p9), 111   ;;  %s2220_s15 = smov (!%p191_p9), 110   ;;  %v257_v43 = vld [vmem:[%s2636_s1 + $0x10] sm:$0xff] (!%p191_p9)  ;;  %vm655_vm10 = vcmask (!%p191_p9), 908288   ;;  %vm744_vm11 = vcmask (!%p191_p9), 900096   ;;  %v258_v50 = vld [vmem:[%s2636_s1 + $0x18] sm:$0xff] (!%p191_p9) }
  0x11   : > { %s2221_s16 = smov (!%p191_p9), 96   ;;  %s2222_s17 = smov (!%p191_p9), 95   ;;  %v225_v13 = vadd.s32 (!%p191_p9), 128, %v224_v11  ;;  %v230_v17 = vand.u32 (!%p191_p9), 15, %v224_v11  ;;  %vm839_vm12 = vcmask (!%p191_p9), 785408   ;;  %v259_v57 = vld [vmem:[%s2636_s1 + $0x20] sm:$0xff] (!%p191_p9) }
  0x12   : > { %s2223_s23 = smov (!%p191_p9), 94   ;;  %vm934_vm13 = vcmask (!%p191_p9), 777216   ;;  %vm1023_vm14 = vcmask (!%p191_p9), 769024   ;;  %vm1157_vm15 = vcmask (!%p191_p9), 64512   ;;  %v1127_v19 = vld [vmem:[%s2638_s3 + $0x18] sm:$0xf] (!%p191_p9) }
  0x13   : > { %v237_v16 = vand.u32 (!%p191_p9), 15, %v225_v13  ;;  %vm2361_vm5 = vcmp.ge.s32.totalorder (!%p191_p9), %v230_v17, 1  ;;  %vm2385_vm8 = vcmp.le.s32.totalorder (!%p191_p9), %v230_v17, 14  ;;  %v1129_v25 = vld [vmem:[%s2638_s3 + $0x20] sm:$0xf] (!%p191_p9) }
  0x15   : > { %s219_s30 = scalar_select %p218_p10, %s2277_s22, 1  ;;  %vm2353_vm3 = vcmp.ge.s32.totalorder %v237_v16, 1  ;;  %vm2368_vm7 = vcmp.le.s32.totalorder %v237_v16, 14  ;;  %v263_v16 = vld [vmem:[%s2636_s1 + $0x40] sm:$0xff] }
  0x17   : > { %s2064_s6 = sshll.u32 %s219_s30, 3 }
  0x18   : > { %s222_s9 = scalar_lea.vmem %s2635_s0, %s2064_s6 }
  0x19   : > { %v254_v0 = vld [vmem:[%s222_s9] sm:$0xff] }
  0x1a   : > { %267 = vrot.lane.b32.xlu0 %v254_v0, %s2214_s10  ;;  %v266_v1 = vcombine.high %v254_v0, %v254_v0 }
  0x1e   : > { %269 = vrot.lane.b32.xlu0 %v266_v1, %s2214_s10  ;;  %v260_v1 = vld [vmem:[%s2636_s1 + $0x28] sm:$0xff] }
  0x8c   : > { %v268_v3 = vpop.permute.xlu0 %267 }
  0x8d   : > { %v2314_v4 = vsel %vm271_vm0, 0.0, %v268_v3 }
  0x8e   : > { %286 = vrot.lane.b32.xlu0 %v2314_v4, %s2216_s11  ;;  %v282_v28 = vsel %vm2361_vm5, %v2314_v4, 0.0 }
  0x90   : > { %v270_v5 = vpop.permute.xlu0 %269 }
  0x91   : > { %v272_v6 = vsel %vm271_vm0, %v268_v3, %v270_v5  ;;  %v277_v7 = vsel %vm271_vm0, %v270_v5, 0.0 }
  0x92   : > { %463 = vrot.lane.b32.xlu0 %v277_v7, %s2217_s12  ;;  %288 = vrot.lane.b32.xlu1 %v272_v6, %s2216_s11  ;;  %v283_v26 = vsel %vm2353_vm3, %v272_v6, 0.0 }
  0x96   : > { %556 = vrot.lane.b32.xlu0 %v272_v6, %s2218_s13  ;;  %290 = vrot.lane.b32.xlu1 %v277_v7, %s2216_s11 }
  0x9a   : > { %554 = vrot.lane.b32.xlu0 %v2314_v4, %s2218_s13  ;;  %461 = vrot.lane.b32.xlu1 %v272_v6, %s2217_s12 }
  0x9e   : > { %653 = vrot.lane.b32.xlu0 %v277_v7, %s2219_s14  ;;  %459 = vrot.lane.b32.xlu1 %v2314_v4, %s2217_s12 }
  0xa2   : > { %740 = vrot.lane.b32.xlu0 %v272_v6, %s2220_s15  ;;  %558 = vrot.lane.b32.xlu1 %v277_v7, %s2218_s13 }
  0xa6   : > { %738 = vrot.lane.b32.xlu0 %v2314_v4, %s2220_s15  ;;  %651 = vrot.lane.b32.xlu1 %v272_v6, %s2219_s14 }
  0xaa   : > { %837 = vrot.lane.b32.xlu0 %v277_v7, %s2221_s16  ;;  %649 = vrot.lane.b32.xlu1 %v2314_v4, %s2219_s14 }
  0xae   : > { %930 = vrot.lane.b32.xlu0 %v272_v6, %s2222_s17  ;;  %742 = vrot.lane.b32.xlu1 %v277_v7, %s2220_s15 }
  0xb2   : > { %928 = vrot.lane.b32.xlu0 %v2314_v4, %s2222_s17  ;;  %835 = vrot.lane.b32.xlu1 %v272_v6, %s2221_s16 }
  0xb6   : > { %1021 = vrot.lane.b32.xlu0 %v277_v7, %s2223_s23  ;;  %833 = vrot.lane.b32.xlu1 %v2314_v4, %s2221_s16 }
  0xba   : > { %932 = vrot.lane.b32.xlu1 %v277_v7, %s2222_s17  ;;  %1114 = vperm.xlu0 %2148, %v264_v8   ;;  %v261_v8 = vld [vmem:[%s2636_s1 + $0x30] sm:$0xff] }
  0xbe   : > { %1019 = vrot.lane.b32.xlu1 %v272_v6, %s2223_s23 }
  0xc2   : > { %1017 = vrot.lane.b32.xlu1 %v2314_v4, %s2223_s23 }
 0x100   : > { %v287_v12 = vpop.permute.xlu0 %286 }
 0x104   : > { %v289_v14 = vpop.permute.xlu1 %288  ;;  %v464_v15 = vpop.permute.xlu0 %463 }
 0x105   : > { %v293_v24 = vsel %vm292_vm1, %v287_v12, %v289_v14 }
 0x108   : > { %v291_v18 = vpop.permute.xlu1 %290  ;;  %v557_v20 = vpop.permute.xlu0 %556 }
 0x109   : > { %v294_v21 = vsel %vm292_vm1, %v289_v14, %v291_v18  ;;  %v262_v14 = vld [vmem:[%s2636_s1 + $0x38] sm:$0xff] }
 0x10a   : > { %2011 = vmatprep.subr.msk.mxu0 %vm299_vm2, %v294_v21 }
 0x10b   : > { %2012 = vmatpush1.msk.msra.mxu0 %vm299_vm2, %v293_v24 }
 0x10c   : > { %v462_v27 = vpop.permute.xlu1 %461  ;;  %2013 = vmatmul.mubr.msk.f32.vlgmr.msra.gmra.mrb[0].mxu0 %vm295_vm4, %v256_v22  ;;  %2014 = vmatprep.subr.msk.mxu0 %vm299_vm2, %v283_v26  ;;  %v555_v31 = vpop.permute.xlu0 %554 }
 0x10d   : > { %v467_v29 = vsel %vm465_vm6, %v462_v27, %v464_v15  ;;  %2015 = vmatpush1.msk.msra.mxu0 %vm299_vm2, %v282_v28  ;;  %448 = vmatprep.mubr.f32.mxu0 %v2215_v2  ;;  %v561_v42 = vsel %vm560_vm9, %v555_v31, %v557_v20 }
 0x10e   : > { %v471_v30 = vsel %vm2368_vm7, %v467_v29, 0.0  ;;  %v565_v45 = vsel %vm2361_vm5, %v561_v42, 0.0 }
 0x10f   : > { %2017 = vmatprep.subr.msk.mxu0 %vm299_vm2, %v471_v30 }
 0x110   : > { %v460_v33 = vpop.permute.xlu1 %459  ;;  %v654_v38 = vpop.permute.xlu0 %653 }
 0x111   : > { %v466_v34 = vsel %vm465_vm6, %v460_v33, %v462_v27  ;;  %v1130_v33 = vld [vmem:[%s2639_s4] sm:$0xf] }
 0x112   : > { %v470_v36 = vsel %vm2385_vm8, %v466_v34, 0.0 }
 0x114   : > { %v559_v37 = vpop.permute.xlu1 %558  ;;  %2016 = vmatmul.mubr.msk.f32.vlgmr.msra.gmra.mrb[0].mxu0 %vm295_vm4, %v255_v35  ;;  %v741_v44 = vpop.permute.xlu0 %740 }
 0x115   : > { %v562_v39 = vsel %vm560_vm9, %v557_v20, %v559_v37  ;;  %2018 = vmatpush1.msk.msra.mxu0 %vm299_vm2, %v470_v36  ;;  %545 = vmatprep.mubr.f32.mxu0 %v2215_v2 }
 0x116   : > { %v566_v40 = vsel %vm2353_vm3, %v562_v39, 0.0  ;;  %v1122_v39 = vld [vmem:[%s2638_s3 + $0x4] sm:$0xf] }
 0x117   : > { %2020 = vmatprep.subr.msk.mxu0 %vm299_vm2, %v566_v40 }
 0x118   : > { %v652_v41 = vpop.permute.xlu1 %651  ;;  %v739_v49 = vpop.permute.xlu0 %738 }
 0x119   : > { %v657_v47 = vsel %vm655_vm10, %v652_v41, %v654_v38  ;;  %v745_v56 = vsel %vm744_vm11, %v739_v49, %v741_v44 }
 0x11a   : > { %v749_v60 = vsel %vm2385_vm8, %v745_v56, 0.0 }
 0x11c   : > { %v650_v46 = vpop.permute.xlu1 %649  ;;  %2019 = vmatmul.mubr.msk.f32.vlgmr.msra.gmra.mrb[0].mxu0 %vm295_vm4, %v257_v43  ;;  %v838_v55 = vpop.permute.xlu0 %837 }
 0x11d   : > { %2021 = vmatpush1.msk.msra.mxu0 %vm299_vm2, %v565_v45  ;;  %640 = vmatprep.mubr.f32.mxu0 %v2215_v2  ;;  %v656_v52 = vsel %vm655_vm10, %v650_v46, %v652_v41  ;;  %v1121_v46 = vld [vmem:[%s2638_s3] sm:$0xf] }
 0x11e   : > { %2023 = vmatprep.subr.msk.mxu0 %vm299_vm2, %v657_v47 }
 0x120   : > { %v743_v48 = vpop.permute.xlu1 %742  ;;  %v931_v61 = vpop.permute.xlu0 %930 }
 0x121   : > { %v746_v51 = vsel %vm744_vm11, %v741_v44, %v743_v48 }
 0x122   : > { %v750_v53 = vsel %vm2368_vm7, %v746_v51, 0.0 }
 0x124   : > { %2022 = vmatmul.mubr.msk.f32.vlgmr.msra.gmra.mrb[0].mxu0 %vm295_vm4, %v258_v50  ;;  %v836_v54 = vpop.permute.xlu1 %835  ;;  %v929_v3 = vpop.permute.xlu0 %928 }
 0x125   : > { %2024 = vmatpush1.msk.msra.mxu0 %vm299_vm2, %v656_v52  ;;  %729 = vmatprep.mubr.f32.mxu0 %v2215_v2  ;;  %v841_v58 = vsel %vm839_vm12, %v836_v54, %v838_v55  ;;  %v935_v10 = vsel %vm934_vm13, %v929_v3, %v931_v61  ;;  %v1123_v52 = vld [vmem:[%s2638_s3 + $0x8] sm:$0xf] }
 0x126   : > { %2026 = vmatprep.subr.msk.mxu0 %vm299_vm2, %v750_v53  ;;  %v845_v62 = vsel %vm2353_vm3, %v841_v58, 0.0  ;;  %v1124_v58 = vld [vmem:[%s2638_s3 + $0xc] sm:$0xf] }
 0x128   : > { %v834_v59 = vpop.permute.xlu1 %833  ;;  %v1022_v7 = vpop.permute.xlu0 %1021 }
 0x129   : > { %v840_v63 = vsel %vm839_vm12, %v834_v59, %v836_v54 }
 0x12a   : > { %v844_v4 = vsel %vm2361_vm5, %v840_v63, 0.0 }
 0x12c   : > { %2025 = vmatmul.mubr.msk.f32.vlgmr.msra.gmra.mrb[0].mxu0 %vm295_vm4, %v259_v57  ;;  %v933_v0 = vpop.permute.xlu1 %932 }
 0x12d   : > { %2027 = vmatpush1.msk.msra.mxu0 %vm299_vm2, %v749_v60  ;;  %824 = vmatprep.mubr.f32.mxu0 %v2215_v2  ;;  %v936_v5 = vsel %vm934_vm13, %v931_v61, %v933_v0  ;;  %v1125_v0 = vld [vmem:[%s2638_s3 + $0x10] sm:$0xf] }
 0x12e   : > { %2029 = vmatprep.subr.msk.mxu0 %vm299_vm2, %v845_v62 }
 0x130   : > { %v1020_v6 = vpop.permute.xlu1 %1019 }
 0x131   : > { %v1025_v9 = vsel %vm1023_vm14, %v1020_v6, %v1022_v7 }
 0x132   : > { %v1029_v11 = vsel %vm2368_vm7, %v1025_v9, 0.0 }
 0x134   : > { %2028 = vmatmul.mubr.msk.f32.vlgmr.msra.gmra.mrb[0].mxu0 %vm295_vm4, %v260_v1  ;;  %v1018_v12 = vpop.permute.xlu1 %1017 }
 0x135   : > { %2030 = vmatpush1.msk.msra.mxu0 %vm299_vm2, %v844_v4  ;;  %919 = vmatprep.mubr.f32.mxu0 %v2215_v2  ;;  %v1024_v13 = vsel %vm1023_vm14, %v1018_v12, %v1020_v6  ;;  %v1126_v6 = vld [vmem:[%s2638_s3 + $0x14] sm:$0xf] }
 0x136   : > { %2032 = vmatprep.subr.msk.mxu0 %vm299_vm2, %v936_v5  ;;  %v1028_v15 = vsel %vm2385_vm8, %v1024_v13, 0.0 }
 0x139   : > { %v1115_v17 = vpop.permute.xlu0 %1114 }
 0x13c   : > { %2031 = vmatmul.mubr.msk.f32.vlgmr.msra.gmra.mrb[0].mxu0 %vm295_vm4, %v261_v8 }
 0x13d   : > { %2033 = vmatpush1.msk.msra.mxu0 %vm299_vm2, %v935_v10  ;;  %1008 = vmatprep.mubr.f32.mxu0 %v2215_v2 }
 0x13e   : > { %2035 = vmatprep.subr.msk.mxu0 %vm299_vm2, %v1029_v11 }
 0x144   : > { %2034 = vmatmul.mubr.msk.f32.vlgmr.msra.gmra.mrb[0].mxu0 %vm295_vm4, %v262_v14 }
 0x145   : > { %2036 = vmatpush1.msk.msra.mxu0 %vm299_vm2, %v1028_v15  ;;  %1103 = vmatprep.mubr.f32.mxu0 %v2215_v2  ;;  %v1128_v15 = vld [vmem:[%s2638_s3 + $0x1c] sm:$0xf] }
 0x14c   : > { %2037 = vmatmul.mubr.msk.f32.vlgmr.msra.gmra.mrb[0].mxu0 %vm295_vm4, %v263_v16 }
 0x21f   : > { %v1105_v18 = vpop.f32.mrb[0].mxu0 }
 0x220   : > { %v1117_v20 = vadd.f32 %v1115_v17, %v1105_v18  ;;  %v1107_v21 = vpop.f32.mrb[1].mxu0 }
 0x221   : > { %v1118_v24 = vadd.f32 %v1115_v17, %v1107_v21 }
 0x222   : > { %v1119_v22 = vmax.f32 %v1117_v20, 0.0 }
 0x223   : > { %v1120_v26 = vmax.f32 %v1118_v24, 0.0 }
 0x224   : > { %1133 = vrot.lane.b32.xlu1 %v1119_v22, %s2214_s10 }
 0x228   : > { %1135 = vrot.lane.b32.xlu1 %v1120_v26, %s2214_s10 }
 0x296   : > { %v1134_v27 = vpop.permute.xlu1 %1133 }
 0x297   : > { %v1141_v31 = vsel %vm271_vm0, 0.0, %v1134_v27 }
 0x29a   : > { %v1136_v28 = vpop.permute.xlu1 %1135 }
 0x29b   : > { %v1137_v29 = vsel %vm271_vm0, %v1134_v27, %v1136_v28  ;;  %v1142_v30 = vsel %vm271_vm0, %v1136_v28, 0.0 }
 0x29c   : > { %1151 = vrot.lane.b32.xlu1 %v1142_v30, %s2216_s11  ;;  %1149 = vrot.lane.b32.xlu0 %v1137_v29, %s2216_s11 }
 0x2a0   : > { %1308 = vrot.lane.b32.xlu1 %v1137_v29, %s2217_s12  ;;  %1147 = vrot.lane.b32.xlu0 %v1141_v31, %s2216_s11 }
 0x2a4   : > { %1306 = vrot.lane.b32.xlu1 %v1141_v31, %s2217_s12  ;;  %1310 = vrot.lane.b32.xlu0 %v1142_v30, %s2217_s12 }
 0x2a8   : > { %1398 = vrot.lane.b32.xlu1 %v1142_v30, %s2218_s13  ;;  %1396 = vrot.lane.b32.xlu0 %v1137_v29, %s2218_s13 }
 0x2ac   : > { %1484 = vrot.lane.b32.xlu1 %v1137_v29, %s2219_s14  ;;  %1394 = vrot.lane.b32.xlu0 %v1141_v31, %s2218_s13 }
 0x2b0   : > { %1482 = vrot.lane.b32.xlu1 %v1141_v31, %s2219_s14  ;;  %1486 = vrot.lane.b32.xlu0 %v1142_v30, %s2219_s14  ;;  %s215_s14 = sand.u32 1, %s2204_s19  }
 0x2b1   : > { %s1931_s30 = scalar_lea.sflag [#allocation3], %s215_s14 }
 0x2b4   : > { %1572 = vrot.lane.b32.xlu1 %v1142_v30, %s2220_s15  ;;  %1570 = vrot.lane.b32.xlu0 %v1137_v29, %s2220_s15 }
 0x2b8   : > { %1658 = vrot.lane.b32.xlu1 %v1137_v29, %s2221_s16  ;;  %1568 = vrot.lane.b32.xlu0 %v1141_v31, %s2220_s15  ;;  %s2008_s15 = sshll.u32 %s215_s14, 3 }
 0x2bc   : > { %1656 = vrot.lane.b32.xlu1 %v1141_v31, %s2221_s16  ;;  %1660 = vrot.lane.b32.xlu0 %v1142_v30, %s2221_s16  ;;  %s2065_s16 = sshll.u32 %s2277_s22, 7  ;;  %s2225_s22 = smov [#allocation2]  }
 0x2bd   : > { %s2593_s26 = scalar_lea.hbm %s2640_s5, %s2065_s16  ;;  %s2154_s7 = sshll.u32 %s2225_s22, 4  ;;  %s2155_s7 = int_to_ptr.vmem [resolvable:$false] %s2154_s7 }
 0x2be   : > { %s2156_s8 = scalar_lea.vmem %s2155_s7, 256 }
 0x2c0   : > { %1748 = vrot.lane.b32.xlu1 %v1142_v30, %s2222_s17  ;;  %1746 = vrot.lane.b32.xlu0 %v1137_v29, %s2222_s17 }
 0x2c4   : > { %1832 = vrot.lane.b32.xlu1 %v1137_v29, %s2223_s23  ;;  %1744 = vrot.lane.b32.xlu0 %v1141_v31, %s2222_s17  ;;  %s217_s17 = scalar_lea.vmem [#allocation2], %s2008_s15 }
 0x2c8   : > { %1830 = vrot.lane.b32.xlu1 %v1141_v31, %s2223_s23  ;;  %1834 = vrot.lane.b32.xlu0 %v1142_v30, %s2223_s23  ;;  %s1945_s23 = sshll.u32 %s217_s17, 4  ;;  %s2595_s23 = int_to_ptr.vmem [resolvable:$true] %s1945_s23 }
 0x2c9   : > { %s2150_s6 = scalar_lea.vmem %s2595_s23, 128  ;;  %p2157_p0 = scmp.lt.s32.totalorder %s2595_s23, %s2155_s7 }
 0x2ca   : > { %p2151_p11 = scmp.ne.s32.totalorder %s2595_s23, %s2150_s6  ;;  %p2158_p1 = scmp.lt.s32.totalorder %s2156_s8, %s2150_s6 }
 0x2cc   : > { %1920 = vperm.xlu0 %2148, %v1130_v33   ;;  %p2152_p12 = pnand %p2151_p11, %p2294_p5  ;;  %p2159_p2 = por %p2158_p1, %p2157_p0 }
 0x2ce   : > { %p2153_p13 = pneg %p2152_p12 }
 0x2d0   : > { %p2160_p3 = pnand %p2159_p2, %p2153_p13 }
 0x30e   : > { %v1152_v34 = vpop.permute.xlu1 %1151  ;;  %v1150_v35 = vpop.permute.xlu0 %1149 }
 0x30f   : > { %v1154_v36 = vsel %vm292_vm1, %v1150_v35, %v1152_v34 }
 0x310   : > { %1161 = vmatprep.subr.mxu1 %v1154_v36 }
 0x312   : > { %v1309_v37 = vpop.permute.xlu1 %1308  ;;  %v1148_v38 = vpop.permute.xlu0 %1147 }
 0x313   : > { %v1153_v40 = vsel %vm292_vm1, %v1148_v38, %v1150_v35 }
 0x314   : > { %1162 = vmatpush1.msra.mxu1 %v1153_v40 }
 0x315   : > { %2038 = vmatmul.mubr.msk.f32.vlgmr.msra.gmra.mrb[0].mxu1 %vm1157_vm15, %v1122_v39  ;;  %2039 = vmatprep.subr.msk.mxu1 %vm2353_vm3, %v1137_v29 }
 0x316   : > { %v1307_v41 = vpop.permute.xlu1 %1306  ;;  %2040 = vmatpush1.msk.msra.mxu1 %vm2361_vm5, %v1141_v31  ;;  %v1311_v42 = vpop.permute.xlu0 %1310  ;;  %1299 = vmatprep.mubr.f32.mxu1 %v2215_v2 }
 0x317   : > { %v1313_v43 = vsel %vm465_vm6, %v1309_v37, %v1311_v42  ;;  %v1312_v47 = vsel %vm465_vm6, %v1307_v41, %v1309_v37 }
 0x318   : > { %2042 = vmatprep.subr.msk.mxu1 %vm2368_vm7, %v1313_v43 }
 0x31a   : > { %v1399_v44 = vpop.permute.xlu1 %1398  ;;  %v1397_v45 = vpop.permute.xlu0 %1396 }
 0x31b   : > { %v1401_v48 = vsel %vm560_vm9, %v1397_v45, %v1399_v44 }
 0x31d   : > { %2041 = vmatmul.mubr.msk.f32.vlgmr.msra.gmra.mrb[0].mxu1 %vm1157_vm15, %v1121_v46 }
 0x31e   : > { %2043 = vmatpush1.msk.msra.mxu1 %vm2385_vm8, %v1312_v47  ;;  %v1485_v49 = vpop.permute.xlu1 %1484  ;;  %v1395_v50 = vpop.permute.xlu0 %1394  ;;  %1385 = vmatprep.mubr.f32.mxu1 %v2215_v2 }
 0x31f   : > { %2045 = vmatprep.subr.msk.mxu1 %vm2353_vm3, %v1401_v48  ;;  %v1400_v54 = vsel %vm560_vm9, %v1395_v50, %v1397_v45 }
 0x322   : > { %v1487_v51 = vpop.permute.xlu0 %1486  ;;  %v1483_v53 = vpop.permute.xlu1 %1482 }
 0x323   : > { %v1489_v55 = vsel %vm655_vm10, %v1485_v49, %v1487_v51  ;;  %v1488_v60 = vsel %vm655_vm10, %v1483_v53, %v1485_v49 }
 0x325   : > { %2044 = vmatmul.mubr.msk.f32.vlgmr.msra.gmra.mrb[0].mxu1 %vm1157_vm15, %v1123_v52 }
 0x326   : > { %2046 = vmatpush1.msk.msra.mxu1 %vm2361_vm5, %v1400_v54  ;;  %v1571_v56 = vpop.permute.xlu0 %1570  ;;  %1473 = vmatprep.mubr.f32.mxu1 %v2215_v2  ;;  %v1573_v57 = vpop.permute.xlu1 %1572 }
 0x327   : > { %1495 = vmatprep.subr.mxu1 %v1489_v55  ;;  %v1575_v61 = vsel %vm744_vm11, %v1571_v56, %v1573_v57 }
 0x32a   : > { %v1569_v59 = vpop.permute.xlu0 %1568  ;;  %v1659_v62 = vpop.permute.xlu1 %1658 }
 0x32b   : > { %v1574_v1 = vsel %vm744_vm11, %v1569_v59, %v1571_v56 }
 0x32d   : > { %2047 = vmatmul.mubr.msk.f32.vlgmr.msra.gmra.mrb[0].mxu1 %vm1157_vm15, %v1124_v58 }
 0x32e   : > { %1496 = vmatpush1.msra.mxu1 %v1488_v60  ;;  %1559 = vmatprep.mubr.f32.mxu1 %v2215_v2  ;;  %v1661_v63 = vpop.permute.xlu0 %1660  ;;  %v1657_v3 = vpop.permute.xlu1 %1656 }
 0x32f   : > { %2049 = vmatprep.subr.msk.mxu1 %vm2368_vm7, %v1575_v61  ;;  %v1663_v4 = vsel %vm839_vm12, %v1659_v62, %v1661_v63  ;;  %v1662_v8 = vsel %vm839_vm12, %v1657_v3, %v1659_v62 }
 0x332   : > { %v1747_v5 = vpop.permute.xlu0 %1746  ;;  %v1749_v7 = vpop.permute.xlu1 %1748 }
 0x333   : > { %v1751_v10 = vsel %vm934_vm13, %v1747_v5, %v1749_v7 }
 0x335   : > { %2048 = vmatmul.mubr.msk.f32.vlgmr.msra.gmra.mrb[0].mxu1 %vm1157_vm15, %v1125_v0 }
 0x336   : > { %2050 = vmatpush1.msk.msra.mxu1 %vm2385_vm8, %v1574_v1  ;;  %1647 = vmatprep.mubr.f32.mxu1 %v2215_v2  ;;  %v1745_v9 = vpop.permute.xlu0 %1744  ;;  %v1833_v12 = vpop.permute.xlu1 %1832 }
 0x337   : > { %2052 = vmatprep.subr.msk.mxu1 %vm2353_vm3, %v1663_v4  ;;  %v1750_v13 = vsel %vm934_vm13, %v1745_v9, %v1747_v5 }
 0x33a   : > { %v1835_v11 = vpop.permute.xlu0 %1834  ;;  %v1831_v23 = vpop.permute.xlu1 %1830 }
 0x33b   : > { %v1837_v14 = vsel %vm1023_vm14, %v1833_v12, %v1835_v11  ;;  %v1836_v16 = vsel %vm1023_vm14, %v1831_v23, %v1833_v12 }
 0x33d   : > { %2051 = vmatmul.mubr.msk.f32.vlgmr.msra.gmra.mrb[0].mxu1 %vm1157_vm15, %v1126_v6 }
 0x33e   : > { %2053 = vmatpush1.msk.msra.mxu1 %vm2361_vm5, %v1662_v8  ;;  %1735 = vmatprep.mubr.f32.mxu1 %v2215_v2 }
 0x33f   : > { %1757 = vmatprep.subr.mxu1 %v1751_v10 }
 0x345   : > { %2054 = vmatmul.mubr.msk.f32.vlgmr.msra.gmra.mrb[0].mxu1 %vm1157_vm15, %v1127_v19 }
 0x346   : > { %1758 = vmatpush1.msra.mxu1 %v1750_v13  ;;  %1821 = vmatprep.mubr.f32.mxu1 %v2215_v2 }
 0x347   : > { %2056 = vmatprep.subr.msk.mxu1 %vm2368_vm7, %v1837_v14 }
 0x34b   : > { %v1921_v17 = vpop.permute.xlu0 %1920 }
 0x34d   : > { %2055 = vmatmul.mubr.msk.f32.vlgmr.msra.gmra.mrb[0].mxu1 %vm1157_vm15, %v1128_v15 }
 0x34e   : > { %2057 = vmatpush1.msk.msra.mxu1 %vm2385_vm8, %v1836_v16  ;;  %1909 = vmatprep.mubr.f32.mxu1 %v2215_v2 }
 0x355   : > { %2058 = vmatmul.mubr.msk.f32.vlgmr.msra.gmra.mrb[0].mxu1 %vm1157_vm15, %v1129_v25 }
 0x428   : > { %v1911_v18 = vpop.f32.mrb[0].mxu1 }
 0x429   : > { %v1923_v20 = vadd.f32 %v1921_v17, %v1911_v18  ;;  %v1913_v21 = vpop.f32.mrb[1].mxu1 }
 0x42a   : > { %v1924_v32 = vadd.f32 %v1921_v17, %v1913_v21 }
 0x42c   : > { %v1927_v22 = vcombine.low %v1923_v20, %v1924_v32 }
 0x42e   : > { %1929 = vst [vmem:[%s217_s17] sm:$0xff] %v1927_v22 }
 0x42f   : > { %2163 = shalt.err (!%p2160_p3)
}
 0x430   : > { %s2164_s10 = scalar_lea.hbm %s2593_s26, 128  ;;  %s2168_s13 = scalar_lea.hbm %s2640_s5, 256 }
 0x431   : > { %p2165_p4 = scmp.ne.s32.totalorder %s2593_s26, %s2164_s10  ;;  %p2169_p9 = scmp.lt.u32.totalorder %s2593_s26, %s2640_s5 }
 0x432   : > { %p2170_p10 = scmp.lt.u32.totalorder %s2168_s13, %s2164_s10  ;;  %p2172_p12 = scmp.lt.u32.totalorder %s2164_s10, %s2593_s26 }
 0x433   : > { %p2166_p7 = pnand %p2165_p4, %p2294_p5 }
 0x434   : > { %p2171_p11 = por %p2170_p10, %p2169_p9 }
 0x435   : > { %p2167_p8 = pneg %p2166_p7 }
 0x436   : > { %p2173_p13 = por %p2172_p12, %p2171_p11 }
 0x438   : > { %p2174_p0 = pnand %p2173_p13, %p2167_p8 }
 0x43a   : > { %2177 = shalt.err (!%p2174_p0)
}
 0x43b   : > { %2098 = dma.vmem_to_hbm [thread:$0]  (%p2294_p5), %s2595_s23, 128, %s2593_s26, %s1931_s30  }
 0x43c PF: > { %p2104_p1 = scmp.ge.s32.totalorder %s2212_s21, 2  ;;  %s1957_s16 = sand.u32 1, %s2200_s18  }
 0x43d   : > { %s1958_s17 = scalar_lea.sflag [#allocation3], %s1957_s16 }
 0x43e   : > { %p2101_p2 = pnand %p2104_p1, %p2298_p6 }
 0x440   : > { %2195 = dma.done.wait (!%p2101_p2), %s1958_s17, 128  }
 0x441   : > { %2197 = vsyncadd (!%p2101_p2), %s1958_s17, 4294967168  ;;  %p15_p3 = scmp.ge.s32.totalorder %s2281_s24, 4   ;;  %s2651_s18 = smov %s2204_s19 }
 0x442   : > { %s2652_s19 = smov %s2208_s20  ;;  %s2653_s20 = smov %s2292_s27 }
 0x443   : > { %s2654_s21 = smov %s2281_s24  ;;  %17 = sbr.rel (!%p15_p3) target bundleno = 3 (0x3), region = 75 }
 0x44a   :  { %1963 = vsyncpa [#allocation3], 1 }
 0x44b   :  { %1965 = vsyncpa [#allocation3 + $0x1], 1 }

</bundles_post_ra>
